<compile_context>
chip_gen: v7x
topology: tpu7x:2x2x1
jax: 0.10.0
libtpu: 0.0.40
codegen_flags: <defaults>
</compile_context>

<pallas_src>
import functools
import math

import jax
import jax.numpy as jnp
from jax import lax
from jax.experimental import pallas as pl
from jax.experimental.pallas import tpu as pltpu

# Large finite negative (avoids -inf - -inf NaN corner cases in the mask path).
_MASK_VALUE = -0.7 * float(jnp.finfo(jnp.float32).max)


def _round_up(x, m):
    return ((x + m - 1) // m) * m


def _dot_xwT(x, w):
    """x @ w.T (contract last dims of both), f32 accumulation."""
    return lax.dot_general(x, w, (((1,), (1,)), ((), ())),
                           preferred_element_type=jnp.float32)


# ---------------------------------------------------------------------------
# Fused Q/K/V projection (one tiled pallas_call, weights resident in VMEM)
# ---------------------------------------------------------------------------
def _qkv_proj_kernel(xq_ref, xk_ref, xv_ref, wq_ref, wk_ref, wv_ref,
                     q_ref, k_ref, v_ref, *, mxu_dtype):
    def proj(x_ref, w_ref, o_ref):
        x = x_ref[...]
        if mxu_dtype is not None:
            x = x.astype(mxu_dtype)          # weights are pre-cast in the wrapper
        o_ref[...] = _dot_xwT(x, w_ref[...]).astype(o_ref.dtype)

    proj(xq_ref, wq_ref, q_ref)
    proj(xk_ref, wk_ref, k_ref)
    proj(xv_ref, wv_ref, v_ref)


def pallas_qkv_proj(xq, xk, xv, wq, wk, wv, *, tm=256, mxu_dtype=None,
                    out_dtype=None, vmem_limit_bytes=None):
    """Three projections in one launch; x blocks pipelined, weights resident."""
    n, h_in = xq.shape
    h_out = wq.shape[0]
    out_dtype = out_dtype or xq.dtype
    tm = min(tm, n)

    if mxu_dtype is not None:
        # Pre-cast the resident weights once (halves their VMEM footprint and
        # avoids a per-tile cast of the resident operand).
        wq, wk, wv = (w.astype(mxu_dtype) for w in (wq, wk, wv))

    x_spec = pl.BlockSpec((tm, h_in), lambda i: (i, 0))
    w_spec = pl.BlockSpec((h_out, h_in), lambda i: (0, 0))   # constant -> resident
    o_spec = pl.BlockSpec((tm, h_out), lambda i: (i, 0))
    o_sds = jax.ShapeDtypeStruct((n, h_out), out_dtype)

    in_b = jnp.dtype(xq.dtype).itemsize
    w_b = jnp.dtype(wq.dtype).itemsize
    out_b = jnp.dtype(out_dtype).itemsize
    cost = pl.CostEstimate(
        flops=2 * 3 * n * h_in * h_out,
        transcendentals=0,
        bytes_accessed=3 * (n * h_in * in_b + h_out * h_in * w_b
                            + n * h_out * out_b))

    cparams = dict(dimension_semantics=("parallel",))
    if vmem_limit_bytes is not None:
        cparams["vmem_limit_bytes"] = vmem_limit_bytes

    return pl.pallas_call(
        functools.partial(_qkv_proj_kernel, mxu_dtype=mxu_dtype),
        out_shape=(o_sds, o_sds, o_sds),
        grid=(pl.cdiv(n, tm),),
        in_specs=[x_spec, x_spec, x_spec, w_spec, w_spec, w_spec],
        out_specs=(o_spec, o_spec, o_spec),
        compiler_params=pltpu.CompilerParams(**cparams),
        cost_estimate=cost,
    )(xq, xk, xv, wq, wk, wv)


# ---------------------------------------------------------------------------
# Multi-head attention with positional term (flash-style online softmax) and
# the output projection fused into the finalize.
# ---------------------------------------------------------------------------
def _attn_kernel(q_ref, k_ref, v_ref, pe_ref, wo_ref, o_ref,
                 m_sc, l_sc, acc_sc, *,
                 nb_heads, head_dim, kv_len, tk, need_mask,
                 mxu_dtype, exp_dtype):
    ki = pl.program_id(2)

    @pl.when(ki == 0)
    def _init():
        m_sc[...] = jnp.full(m_sc.shape, -jnp.inf, dtype=m_sc.dtype)
        l_sc[...] = jnp.zeros(l_sc.shape, dtype=l_sc.dtype)
        acc_sc[...] = jnp.zeros(acc_sc.shape, dtype=acc_sc.dtype)

    K, D = nb_heads, head_dim
    compute_dt = jnp.float32 if mxu_dtype is None else mxu_dtype

    q_blk = q_ref[0]                                  # (tq, H), 1/sqrt(D) pre-folded
    k_blk = k_ref[0]                                  # (tk, H)
    v_blk = v_ref[0]                                  # (tk, H)
    pe = pe_ref[0].astype(compute_dt)                 # (tk, D), pre-transposed

    if need_mask:
        col = ki * tk + lax.broadcasted_iota(jnp.int32, (1, tk), 1)
        mask_bias = jnp.where(col < kv_len, 0.0, _MASK_VALUE).astype(jnp.float32)
    else:
        mask_bias = None

    # TODO(synk): for very large head counts (K >= 16) switch this static
    #             unroll to a lax.fori_loop with pl.ds head slicing to bound
    #             vreg live ranges.
    for h in range(K):
        lo = h * D
        q_h = q_blk[:, lo:lo + D].astype(compute_dt)          # (tq, D)
        k_h = k_blk[:, lo:lo + D].astype(compute_dt)          # (tk, D)
        v_h = v_blk[:, lo:lo + D].astype(compute_dt)          # (tk, D)

        # Content + positional scores merged into a single MXU matmul per head:
        # s = q_h @ (k_h + pe)^T — contraction over last dims, no transpose.
        s = lax.dot_general(q_h, k_h + pe, (((1,), (1,)), ((), ())),
                            preferred_element_type=jnp.float32)   # (tq, tk)
        if need_mask:
            s = s + mask_bias                                  # (1,tk) VPU bcast add

        # Online-softmax update (running max / sum / accumulator in scratch).
        m_prev = m_sc[h]                                       # (tq, 1)
        m_new = jnp.maximum(m_prev, jnp.max(s, axis=-1, keepdims=True))
        alpha = jnp.exp(m_prev - m_new)
        p = jnp.exp((s - m_new).astype(exp_dtype))             # (tq, tk)
        l_sc[h] = alpha * l_sc[h] + jnp.sum(p.astype(jnp.float32),
                                            axis=-1, keepdims=True)
        acc_sc[h] = alpha * acc_sc[h] + lax.dot_general(
            p.astype(compute_dt), v_h, (((1,), (0,)), ((), ())),
            preferred_element_type=jnp.float32)
        m_sc[h] = m_new

    @pl.when(ki == pl.num_programs(2) - 1)
    def _finalize():
        # Head-merged (tq, H) context, normalized per head (EUP reciprocal),
        # then the fused output projection and ONE lane-dense (tq, H) store.
        parts = []
        for h in range(K):
            inv_l = pl.reciprocal(l_sc[h], approx=True)        # EUP slot
            parts.append(acc_sc[h] * inv_l)
        ctx = jnp.concatenate(parts, axis=-1)                  # (tq, H) f32
        if mxu_dtype is not None:
            ctx = ctx.astype(mxu_dtype)
        out = _dot_xwT(ctx, wo_ref[...])                       # (tq, H) f32 acc
        o_ref[0] = out.astype(o_ref.dtype)


def pallas_seq_attention(q, k, v, key_pe_t, wo, nb_heads, *,
                         tq=256, tk=512, mxu_dtype=None, exp_dtype=None,
                         out_dtype=None, vmem_limit_bytes=None):
    """q/k/v: (B, M, H); key_pe_t: (1, M, D); wo: (H, H) -> out: (B, M, H)."""
    b, m, h_dim = q.shape
    assert h_dim % nb_heads == 0
    d = h_dim // nb_heads
    assert key_pe_t.shape == (1, m, d), (
        f"key_pe_t must be (1, {m}, {d}) (span == seq_len), got {key_pe_t.shape}")
    out_dtype = out_dtype or q.dtype
    exp_dtype = exp_dtype or jnp.float32

    # Tiles always divide the (possibly padded) sequence length.
    def tile_pad(length, cap):
        if length <= cap:
            return length, length
        return cap, _round_up(length, cap)

    tq_eff, mq_pad = tile_pad(m, tq)
    tk_eff, mk_pad = tile_pad(m, tk)

    def pad_seq(x, new_len):
        if new_len == x.shape[1]:
            return x
        return jnp.pad(x, ((0, 0), (0, new_len - x.shape[1]), (0, 0)))

    q_p = pad_seq(q, mq_pad)
    k_p = pad_seq(k, mk_pad)
    v_p = pad_seq(v, mk_pad)
    pe_p = pad_seq(key_pe_t, mk_pad)
    need_mask = mk_pad != m

    if mxu_dtype is not None:
        wo = wo.astype(mxu_dtype)          # halves the resident wo footprint

    grid = (b, mq_pad // tq_eff, mk_pad // tk_eff)

    kernel = functools.partial(
        _attn_kernel, nb_heads=nb_heads, head_dim=d, kv_len=m, tk=tk_eff,
        need_mask=need_mask, mxu_dtype=mxu_dtype, exp_dtype=exp_dtype)

    in_b = jnp.dtype(q.dtype).itemsize
    out_b = jnp.dtype(out_dtype).itemsize
    n_q_tiles = mq_pad // tq_eff
    cost = pl.CostEstimate(
        flops=4 * b * mq_pad * mk_pad * h_dim + 2 * b * mq_pad * h_dim * h_dim,
        transcendentals=b * nb_heads * mq_pad * mk_pad,
        bytes_accessed=(b * mq_pad * h_dim * (in_b + out_b)
                        + 2 * b * n_q_tiles * mk_pad * h_dim * in_b
                        + h_dim * h_dim * jnp.dtype(wo.dtype).itemsize))

    cparams = dict(dimension_semantics=("parallel", "parallel", "arbitrary"))
    if vmem_limit_bytes is not None:
        cparams["vmem_limit_bytes"] = vmem_limit_bytes

    out = pl.pallas_call(
        kernel,
        out_shape=jax.ShapeDtypeStruct((b, mq_pad, h_dim), out_dtype),
        grid=grid,
        in_specs=[
            pl.BlockSpec((1, tq_eff, h_dim), lambda bi, qi, ki: (bi, qi, 0)),
            pl.BlockSpec((1, tk_eff, h_dim), lambda bi, qi, ki: (bi, ki, 0)),
            pl.BlockSpec((1, tk_eff, h_dim), lambda bi, qi, ki: (bi, ki, 0)),
            pl.BlockSpec((1, tk_eff, d), lambda bi, qi, ki: (0, ki, 0)),
            pl.BlockSpec((h_dim, h_dim), lambda bi, qi, ki: (0, 0)),  # resident wo
        ],
        out_specs=pl.BlockSpec((1, tq_eff, h_dim), lambda bi, qi, ki: (bi, qi, 0)),
        scratch_shapes=[
            pltpu.VMEM((nb_heads, tq_eff, 1), jnp.float32),   # running max
            pltpu.VMEM((nb_heads, tq_eff, 1), jnp.float32),   # running sum
            pltpu.VMEM((nb_heads, tq_eff, d), jnp.float32),   # output accumulator
        ],
        compiler_params=pltpu.CompilerParams(**cparams),
        cost_estimate=cost,
    )(q_p, k_p, v_p, pe_p, wo)

    if mq_pad != m:
        out = out[:, :m, :]
    return out


# ---------------------------------------------------------------------------
# Module forward
# ---------------------------------------------------------------------------
def multi_head_seq_attention(query, key, value, key_pe, params, nb_heads, *,
                             mxu_dtype=None, exp_dtype=None,
                             tq=256, tk=512, proj_tm=256,
                             vmem_limit_bytes=None):
    """Forward pass of MultiHeadSeqAttention (eval mode, un-cached L == M)."""
    b, m, h = query.shape
    assert h % nb_heads == 0
    d = h // nb_heads
    assert key.shape == (b, m, h) and value.shape == (b, m, h)
    assert key_pe.shape == (1, d, m)

    # Fold 1/sqrt(D) into wq so the scale is applied once under the
    # projection's MXU work instead of K times per KV step on the VPU.
    wq = params["wq"] * jnp.asarray(1.0 / math.sqrt(d), params["wq"].dtype)

    inter_dtype = query.dtype if mxu_dtype is None else mxu_dtype
    # Fused Q/K/V projection: one launch, weights resident, row-tiled.
    # (B, M, H) <-> (B*M, H) reshapes are free row-major views.
    q, k, v = pallas_qkv_proj(
        query.reshape(b * m, h), key.reshape(b * m, h), value.reshape(b * m, h),
        wq, params["wk"], params["wv"],
        tm=proj_tm, mxu_dtype=mxu_dtype, out_dtype=inter_dtype,
        vmem_limit_bytes=vmem_limit_bytes)

    # One-time transpose of the tiny positional table to (1, M, D) so the
    # attention MXU consumes (tk, D) operands directly (no per-head k.T).
    key_pe_t = jnp.transpose(key_pe, (0, 2, 1))

    # Attention + fused output projection: heads split/merged inside the
    # kernel, output written as a single lane-dense (tq, H) tile.
    out = pallas_seq_attention(
        q.reshape(b, m, h), k.reshape(b, m, h), v.reshape(b, m, h),
        key_pe_t, params["wo"], nb_heads,
        tq=tq, tk=tk, mxu_dtype=mxu_dtype, exp_dtype=exp_dtype,
        out_dtype=query.dtype, vmem_limit_bytes=vmem_limit_bytes)
    return out


# ---------------------------------------------------------------------------
# Pure-JAX reference for self-check
# ---------------------------------------------------------------------------
def _head_reshape_ref(x, nb_heads, head_dim):
    b, m, _ = x.shape
    x = x.reshape(b, m, nb_heads, head_dim)
    x = jnp.transpose(x, (0, 2, 1, 3))
    return x.reshape(b * nb_heads, m, head_dim)


def reference_forward(query, key, value, key_pe, params, nb_heads):
    b, m, h = query.shape
    d = h // nb_heads
    q = _head_reshape_ref(query @ params["wq"].T, nb_heads, d)
    v = _head_reshape_ref(value @ params["wv"].T, nb_heads, d)
    k = _head_reshape_ref(key @ params["wk"].T, nb_heads, d)
    scores = (jnp.einsum("bmd,bnd->bmn", q, k)
              + jnp.einsum("bmd,xdn->bmn", q, key_pe)) / math.sqrt(d)
    probs = jax.nn.softmax(scores, axis=-1)
    out = jnp.einsum("bmn,bnd->bmd", probs, v)
    out = out.reshape(b, nb_heads, m, d).transpose(0, 2, 1, 3).reshape(b, m, h)
    return out @ params["wo"].T


# ---------------------------------------------------------------------------
if __name__ == "__main__":
    B, M, H, K = 2, 8, 32, 4
    D = H // K

    root = jax.random.PRNGKey(0)
    ks = jax.random.split(root, 8)

    params = {
        "wq": 0.05 * jax.random.normal(ks[0], (H, H), jnp.float32),
        "wk": 0.05 * jax.random.normal(ks[1], (H, H), jnp.float32),
        "wv": 0.05 * jax.random.normal(ks[2], (H, H), jnp.float32),
        "wo": 0.05 * jax.random.normal(ks[3], (H, H), jnp.float32),
    }

    query = jax.random.normal(ks[4], (B, M, H), jnp.float32)
    key_in = jax.random.normal(ks[5], (B, M, H), jnp.float32)
    value = jax.random.normal(ks[6], (B, M, H), jnp.float32)
    key_pe = 0.05 * jax.random.normal(ks[7], (1, D, M), jnp.float32)

    # 1) f32 path, single tile (exact reference check).
    out = multi_head_seq_attention(query, key_in, value, key_pe, params, K)
    out = jax.block_until_ready(out)
    ref = reference_forward(query, key_in, value, key_pe, params, K)
    assert out.shape == (B, M, H)
    assert jnp.allclose(out, ref, rtol=2e-3, atol=2e-3), "f32 mismatch vs reference"

    # 2) f32 path exercising multi-tile flash accumulation + KV padding/mask
    #    (M=20 with 8-wide tiles -> padded to 24, 3 q tiles x 3 kv tiles).
    M2 = 20
    q2 = jax.random.normal(jax.random.PRNGKey(1), (B, M2, H), jnp.float32)
    k2 = jax.random.normal(jax.random.PRNGKey(2), (B, M2, H), jnp.float32)
    v2 = jax.random.normal(jax.random.PRNGKey(3), (B, M2, H), jnp.float32)
    pe2 = 0.05 * jax.random.normal(jax.random.PRNGKey(4), (1, D, M2), jnp.float32)
    out2 = multi_head_seq_attention(q2, k2, v2, pe2, params, K, tq=8, tk=8)
    out2 = jax.block_until_ready(out2)
    ref2 = reference_forward(q2, k2, v2, pe2, params, K)
    assert out2.shape == (B, M2, H)
    assert jnp.allclose(out2, ref2, rtol=2e-3, atol=2e-3), "tiled/masked mismatch"

    # 3) bf16 MXU operands + bf16 q/k/v intermediates + bf16 exp (the v6e/v7x
    #    performance configuration); f32 accumulation keeps it close.
    out3 = multi_head_seq_attention(query, key_in, value, key_pe, params, K,
                                    mxu_dtype=jnp.bfloat16,
                                    exp_dtype=jnp.bfloat16)
    out3 = jax.block_until_ready(out3)
    assert jnp.allclose(out3, ref, rtol=5e-2, atol=2e-2), "bf16 path mismatch"

    print("KERNEL_OK")
</pallas_src>

<mosaic_0001>
module attributes {stable_mosaic.version = 11 : i64} {
  func.func @_qkv_proj_kernel(%arg0: i32, %arg1: memref<16x32xf32, #tpu.memory_space<vmem>>, %arg2: memref<16x32xf32, #tpu.memory_space<vmem>>, %arg3: memref<16x32xf32, #tpu.memory_space<vmem>>, %arg4: memref<32x32xf32, #tpu.memory_space<vmem>>, %arg5: memref<32x32xf32, #tpu.memory_space<vmem>>, %arg6: memref<32x32xf32, #tpu.memory_space<vmem>>, %arg7: memref<16x32xf32, #tpu.memory_space<vmem>>, %arg8: memref<16x32xf32, #tpu.memory_space<vmem>>, %arg9: memref<16x32xf32, #tpu.memory_space<vmem>>) attributes {dimension_semantics = [#tpu.dimension_semantics<parallel>], iteration_bounds = array<i64: 1>, scalar_prefetch = 0 : i64, scratch_operands = 0 : i64, tpu.core_type = #tpu.core_type<tc>, window_params = [{transform_indices = @transform_0, window_bounds = array<i64: 16, 32>}, {transform_indices = @transform_1, window_bounds = array<i64: 16, 32>}, {transform_indices = @transform_2, window_bounds = array<i64: 16, 32>}, {pipeline_mode = #tpu.pipeline_mode<synchronous>, transform_indices = @transform_3, window_bounds = array<i64: 32, 32>}, {pipeline_mode = #tpu.pipeline_mode<synchronous>, transform_indices = @transform_4, window_bounds = array<i64: 32, 32>}, {pipeline_mode = #tpu.pipeline_mode<synchronous>, transform_indices = @transform_5, window_bounds = array<i64: 32, 32>}, {transform_indices = @transform_6, window_bounds = array<i64: 16, 32>}, {transform_indices = @transform_7, window_bounds = array<i64: 16, 32>}, {transform_indices = @transform_8, window_bounds = array<i64: 16, 32>}]} {
    %c0 = arith.constant 0 : index
    %c0_0 = arith.constant 0 : index
    %0 = vector.load %arg1[%c0, %c0_0] : memref<16x32xf32, #tpu.memory_space<vmem>>, vector<16x32xf32>
    %c0_1 = arith.constant 0 : index
    %c0_2 = arith.constant 0 : index
    %1 = vector.load %arg4[%c0_1, %c0_2] : memref<32x32xf32, #tpu.memory_space<vmem>>, vector<32x32xf32>
    %cst = arith.constant dense<0.000000e+00> : vector<16x32xf32>
    %2 = tpu.matmul %0, %1, %cst {dimension_numbers = #tpu.dot_dimension_numbers<[1], [1], [0], [0], [0, 0, 1, 0], [], []>} : vector<16x32xf32>, vector<32x32xf32>, vector<16x32xf32> -> vector<16x32xf32>
    %c0_3 = arith.constant 0 : index
    %c0_4 = arith.constant 0 : index
    %3 = vector.load %arg7[%c0_3, %c0_4] : memref<16x32xf32, #tpu.memory_space<vmem>>, vector<16x32xf32>
    tpu.vector_store %arg7[%c0_3, %c0_4], %2 {strides = array<i32>} : memref<16x32xf32, #tpu.memory_space<vmem>>, vector<16x32xf32>,
    %c0_5 = arith.constant 0 : index
    %c0_6 = arith.constant 0 : index
    %4 = vector.load %arg2[%c0_5, %c0_6] : memref<16x32xf32, #tpu.memory_space<vmem>>, vector<16x32xf32>
    %c0_7 = arith.constant 0 : index
    %c0_8 = arith.constant 0 : index
    %5 = vector.load %arg5[%c0_7, %c0_8] : memref<32x32xf32, #tpu.memory_space<vmem>>, vector<32x32xf32>
    %cst_9 = arith.constant dense<0.000000e+00> : vector<16x32xf32>
    %6 = tpu.matmul %4, %5, %cst_9 {dimension_numbers = #tpu.dot_dimension_numbers<[1], [1], [0], [0], [0, 0, 1, 0], [], []>} : vector<16x32xf32>, vector<32x32xf32>, vector<16x32xf32> -> vector<16x32xf32>
    %c0_10 = arith.constant 0 : index
    %c0_11 = arith.constant 0 : index
    %7 = vector.load %arg8[%c0_10, %c0_11] : memref<16x32xf32, #tpu.memory_space<vmem>>, vector<16x32xf32>
    tpu.vector_store %arg8[%c0_10, %c0_11], %6 {strides = array<i32>} : memref<16x32xf32, #tpu.memory_space<vmem>>, vector<16x32xf32>,
    %c0_12 = arith.constant 0 : index
    %c0_13 = arith.constant 0 : index
    %8 = vector.load %arg3[%c0_12, %c0_13] : memref<16x32xf32, #tpu.memory_space<vmem>>, vector<16x32xf32>
    %c0_14 = arith.constant 0 : index
    %c0_15 = arith.constant 0 : index
    %9 = vector.load %arg6[%c0_14, %c0_15] : memref<32x32xf32, #tpu.memory_space<vmem>>, vector<32x32xf32>
    %cst_16 = arith.constant dense<0.000000e+00> : vector<16x32xf32>
    %10 = tpu.matmul %8, %9, %cst_16 {dimension_numbers = #tpu.dot_dimension_numbers<[1], [1], [0], [0], [0, 0, 1, 0], [], []>} : vector<16x32xf32>, vector<32x32xf32>, vector<16x32xf32> -> vector<16x32xf32>
    %c0_17 = arith.constant 0 : index
    %c0_18 = arith.constant 0 : index
    %11 = vector.load %arg9[%c0_17, %c0_18] : memref<16x32xf32, #tpu.memory_space<vmem>>, vector<16x32xf32>
    tpu.vector_store %arg9[%c0_17, %c0_18], %10 {strides = array<i32>} : memref<16x32xf32, #tpu.memory_space<vmem>>, vector<16x32xf32>,
    return
  }
  func.func @transform_0(%arg0: i32) -> (i32, i32) {
    %c0_i32 = arith.constant 0 : i32
    %c0_i32_0 = arith.constant 0 : i32
    return %arg0, %c0_i32 : i32, i32
  }
  func.func @transform_1(%arg0: i32) -> (i32, i32) {
    %c0_i32 = arith.constant 0 : i32
    %c0_i32_0 = arith.constant 0 : i32
    return %arg0, %c0_i32 : i32, i32
  }
  func.func @transform_2(%arg0: i32) -> (i32, i32) {
    %c0_i32 = arith.constant 0 : i32
    %c0_i32_0 = arith.constant 0 : i32
    return %arg0, %c0_i32 : i32, i32
  }
  func.func @transform_3(%arg0: i32) -> (i32, i32) {
    %c0_i32 = arith.constant 0 : i32
    %c0_i32_0 = arith.constant 0 : i32
    %c0_i32_1 = arith.constant 0 : i32
    return %c0_i32, %c0_i32_0 : i32, i32
  }
  func.func @transform_4(%arg0: i32) -> (i32, i32) {
    %c0_i32 = arith.constant 0 : i32
    %c0_i32_0 = arith.constant 0 : i32
    %c0_i32_1 = arith.constant 0 : i32
    return %c0_i32, %c0_i32_0 : i32, i32
  }
  func.func @transform_5(%arg0: i32) -> (i32, i32) {
    %c0_i32 = arith.constant 0 : i32
    %c0_i32_0 = arith.constant 0 : i32
    %c0_i32_1 = arith.constant 0 : i32
    return %c0_i32, %c0_i32_0 : i32, i32
  }
  func.func @transform_6(%arg0: i32) -> (i32, i32) {
    %c0_i32 = arith.constant 0 : i32
    %c0_i32_0 = arith.constant 0 : i32
    return %arg0, %c0_i32 : i32, i32
  }
  func.func @transform_7(%arg0: i32) -> (i32, i32) {
    %c0_i32 = arith.constant 0 : i32
    %c0_i32_0 = arith.constant 0 : i32
    return %arg0, %c0_i32 : i32, i32
  }
  func.func @transform_8(%arg0: i32) -> (i32, i32) {
    %c0_i32 = arith.constant 0 : i32
    %c0_i32_0 = arith.constant 0 : i32
    return %arg0, %c0_i32 : i32, i32
  }
}

</mosaic_0001>

<bundles_post_ra>
// kernel: tpu_custom_call.1
= control target key start
LH: loop header
LB: loop body
LE: loop exit
PB: predicated region body
PF: predicated region fallthrough
CT: control target
= control target key end

     0   :  { %14 = vsyncpa [#allocation3], 0  ;;  %s1052_s0 = inlined_call_operand.hbm [shape: f32[16,32], index: 0, kind: input, shape index: {}]   ;;  %s1053_s1 = inlined_call_operand.hbm [shape: f32[16,32], index: 1, kind: input, shape index: {}]   ;;  %s1054_s2 = inlined_call_operand.hbm [shape: f32[16,32], index: 2, kind: input, shape index: {}]   ;;  %s1055_s3 = inlined_call_operand.hbm [shape: f32[32,32], index: 3, kind: input, shape index: {}]   ;;  %s1056_s4 = inlined_call_operand.hbm [shape: f32[32,32], index: 4, kind: input, shape index: {}]   ;;  %s1057_s5 = inlined_call_operand.hbm [shape: f32[32,32], index: 5, kind: input, shape index: {}]   ;;  %s1058_s6 = inlined_call_operand.hbm [shape: f32[16,32], index: 6, kind: output, shape index: {0}]   ;;  %s1059_s7 = inlined_call_operand.hbm [shape: f32[16,32], index: 7, kind: output, shape index: {1}]   ;;  %s1060_s8 = inlined_call_operand.hbm [shape: f32[16,32], index: 8, kind: output, shape index: {2}]  }
   0x1   :  { %15 = vsyncpa [#allocation6], 0 }
   0x2   :  { %16 = vsyncpa [#allocation9], 0 }
   0x3   :  { %17 = vsyncpa [#allocation12], 0 }
   0x4   :  { %18 = vsyncpa [#allocation4], 0 }
   0x5   :  { %19 = vsyncpa [#allocation15], 0  ;;  %s791_s27 = smov [#allocation5]   ;;  %s792_s29 = smov [#allocation8]  }
   0x6   :  { %s37_s28 = sshll.u32 %s791_s27, 4  ;;  %s61_s30 = sshll.u32 %s792_s29, 4  ;;  %s38_s28 = int_to_ptr.vmem [resolvable:$true] %s37_s28  ;;  %s847_s30 = int_to_ptr.vmem [resolvable:$true] %s61_s30 }
   0x7   :  { %s581_s11 = scalar_lea.hbm %s1053_s1, 256 }
   0x8   :  { %p582_p0 = scmp.ne.s32.totalorder %s1053_s1, %s581_s11  ;;  %p585_p1 = scmp.lt.u32.totalorder %s581_s11, %s1053_s1 }
   0xa   :  { %p587_p2 = pnand %p585_p1, %p582_p0 }
   0xc   :  { %590 = shalt.err (!%p587_p2)
}
   0xd   :  { %s591_s16 = scalar_lea.vmem %s38_s28, 256  ;;  %p596_p4 = scmp.lt.s32.totalorder %s38_s28, %s38_s28 }
   0xe   :  { %p592_p3 = scmp.ne.s32.totalorder %s38_s28, %s591_s16  ;;  %p597_p5 = scmp.lt.s32.totalorder %s591_s16, %s591_s16 }
  0x10   :  { %p598_p6 = por %p597_p5, %p596_p4 }
  0x12   :  { %p599_p7 = pnand %p598_p6, %p592_p3 }
  0x14   :  { %602 = shalt.err (!%p599_p7)
}
  0x15   :  { %s793_s17 = smov 128   ;;  %s794_s18 = smov 8  }
  0x16   :  { %43 = dma.hbm_to_vmem [thread:$0]  %s1053_s1, 256, %s38_s28, [#allocation6], %s793_s17, %s793_s17, %s794_s18  }
  0x17   :  { %s603_s23 = scalar_lea.hbm %s1055_s3, 512 }
  0x18   :  { %p604_p8 = scmp.ne.s32.totalorder %s1055_s3, %s603_s23  ;;  %p607_p9 = scmp.lt.u32.totalorder %s603_s23, %s1055_s3 }
  0x1a   :  { %p609_p10 = pnand %p607_p9, %p604_p8 }
  0x1c   :  { %612 = shalt.err (!%p609_p10)
}
  0x1d   :  { %s613_s29 = scalar_lea.vmem %s847_s30, 512  ;;  %p618_p12 = scmp.lt.s32.totalorder %s847_s30, %s847_s30 }
  0x1e   :  { %p614_p11 = scmp.ne.s32.totalorder %s847_s30, %s613_s29  ;;  %p619_p13 = scmp.lt.s32.totalorder %s613_s29, %s613_s29 }
  0x20   :  { %p620_p0 = por %p619_p13, %p618_p12 }
  0x22   :  { %p621_p1 = pnand %p620_p0, %p614_p11 }
  0x24   :  { %624 = shalt.err (!%p621_p1)
}
  0x25   :  { %67 = dma.hbm_to_vmem [thread:$0]  %s1055_s3, 512, %s847_s30, [#allocation9], %s793_s17, %s793_s17, %s794_s18  }
  0x26   :  { %s795_s9 = smov [#allocation2]   ;;  %s796_s11 = smov [#allocation7]  }
  0x27   :  { %s25_s10 = sshll.u32 %s795_s9, 4  ;;  %s49_s12 = sshll.u32 %s796_s11, 4  ;;  %s26_s10 = int_to_ptr.vmem [resolvable:$true] %s25_s10  ;;  %s884_s12 = int_to_ptr.vmem [resolvable:$true] %s49_s12 }
  0x28   :  { %s625_s15 = scalar_lea.hbm %s1052_s0, 256 }
  0x29   :  { %p626_p2 = scmp.ne.s32.totalorder %s1052_s0, %s625_s15  ;;  %p629_p3 = scmp.lt.u32.totalorder %s625_s15, %s1052_s0 }
  0x2b   :  { %p631_p4 = pnand %p629_p3, %p626_p2 }
  0x2d   :  { %634 = shalt.err (!%p631_p4)
}
  0x2e   :  { %s635_s3 = scalar_lea.vmem %s26_s10, 256  ;;  %p640_p6 = scmp.lt.s32.totalorder %s26_s10, %s26_s10 }
  0x2f   :  { %p636_p5 = scmp.ne.s32.totalorder %s26_s10, %s635_s3  ;;  %p641_p7 = scmp.lt.s32.totalorder %s635_s3, %s635_s3 }
  0x31   :  { %p642_p8 = por %p641_p7, %p640_p6 }
  0x33   :  { %p643_p9 = pnand %p642_p8, %p636_p5 }
  0x35   :  { %646 = shalt.err (!%p643_p9)
}
  0x36   :  { %31 = dma.hbm_to_vmem [thread:$0]  %s1052_s0, 256, %s26_s10, [#allocation3], %s793_s17, %s793_s17, %s794_s18  }
  0x37   :  { %s647_s25 = scalar_lea.hbm %s1054_s2, 256 }
  0x38   :  { %p648_p10 = scmp.ne.s32.totalorder %s1054_s2, %s647_s25  ;;  %p651_p11 = scmp.lt.u32.totalorder %s647_s25, %s1054_s2 }
  0x3a   :  { %p653_p12 = pnand %p651_p11, %p648_p10 }
  0x3c   :  { %656 = shalt.err (!%p653_p12)
}
  0x3d   :  { %s657_s28 = scalar_lea.vmem %s884_s12, 256  ;;  %p662_p0 = scmp.lt.s32.totalorder %s884_s12, %s884_s12 }
  0x3e   :  { %p658_p13 = scmp.ne.s32.totalorder %s884_s12, %s657_s28  ;;  %p663_p1 = scmp.lt.s32.totalorder %s657_s28, %s657_s28 }
  0x40   :  { %p664_p2 = por %p663_p1, %p662_p0 }
  0x42   :  { %p665_p3 = pnand %p664_p2, %p658_p13 }
  0x44   :  { %668 = shalt.err (!%p665_p3)
}
  0x45   :  { %55 = dma.hbm_to_vmem [thread:$0]  %s1054_s2, 256, %s884_s12, [#allocation6], %s793_s17, %s793_s17, %s794_s18  }
  0x46   :  { %s797_s10 = smov [#allocation10]   ;;  %s798_s13 = smov [#allocation11]  }
  0x47   :  { %s73_s11 = sshll.u32 %s797_s10, 4  ;;  %s85_s14 = sshll.u32 %s798_s13, 4  ;;  %s74_s11 = int_to_ptr.vmem [resolvable:$true] %s73_s11  ;;  %s921_s14 = int_to_ptr.vmem [resolvable:$true] %s85_s14 }
  0x48   :  { %s669_s19 = scalar_lea.hbm %s1056_s4, 512 }
  0x49   :  { %p670_p4 = scmp.ne.s32.totalorder %s1056_s4, %s669_s19  ;;  %p673_p5 = scmp.lt.u32.totalorder %s669_s19, %s1056_s4 }
  0x4b   :  { %p675_p6 = pnand %p673_p5, %p670_p4 }
  0x4d   :  { %678 = shalt.err (!%p675_p6)
}
  0x4e   :  { %s679_s2 = scalar_lea.vmem %s74_s11, 512  ;;  %p684_p8 = scmp.lt.s32.totalorder %s74_s11, %s74_s11 }
  0x4f   :  { %p680_p7 = scmp.ne.s32.totalorder %s74_s11, %s679_s2  ;;  %p685_p9 = scmp.lt.s32.totalorder %s679_s2, %s679_s2 }
  0x51   :  { %p686_p10 = por %p685_p9, %p684_p8 }
  0x53   :  { %p687_p11 = pnand %p686_p10, %p680_p7 }
  0x55   :  { %690 = shalt.err (!%p687_p11)
}
  0x56   :  { %79 = dma.hbm_to_vmem [thread:$0]  %s1056_s4, 512, %s74_s11, [#allocation9], %s793_s17, %s793_s17, %s794_s18  }
  0x57   :  { %s691_s25 = scalar_lea.hbm %s1057_s5, 512 }
  0x58   :  { %p692_p12 = scmp.ne.s32.totalorder %s1057_s5, %s691_s25  ;;  %p695_p13 = scmp.lt.u32.totalorder %s691_s25, %s1057_s5 }
  0x5a   :  { %p697_p0 = pnand %p695_p13, %p692_p12 }
  0x5c   :  { %700 = shalt.err (!%p697_p0)
}
  0x5d   :  { %s701_s28 = scalar_lea.vmem %s921_s14, 512  ;;  %p706_p2 = scmp.lt.s32.totalorder %s921_s14, %s921_s14 }
  0x5e   :  { %p702_p1 = scmp.ne.s32.totalorder %s921_s14, %s701_s28  ;;  %p707_p3 = scmp.lt.s32.totalorder %s701_s28, %s701_s28 }
  0x60   :  { %p708_p4 = por %p707_p3, %p706_p2 }
  0x62   :  { %p709_p5 = pnand %p708_p4, %p702_p1 }
  0x64   :  { %712 = shalt.err (!%p709_p5)
}
  0x65   :  { %91 = dma.hbm_to_vmem [thread:$0]  %s1057_s5, 512, %s921_s14, [#allocation12], %s793_s17, %s793_s17, %s794_s18  }
  0x66   :  { %779 = dma.done.wait [#allocation3], 256  }
  0x67   :  { %780 = vsyncadd [#allocation3], 4294967040 }
  0x68   :  { %781 = dma.done.wait [#allocation6], 512  }
  0x69   :  { %782 = vsyncadd [#allocation6], 4294966784 }
  0x6a   :  { %783 = dma.done.wait [#allocation9], 1024  }
  0x6b   :  { %784 = vsyncadd [#allocation9], 4294966272 }
  0x6c   :  { %785 = dma.done.wait [#allocation12], 512  }
  0x6d   :  { %786 = vsyncadd [#allocation12], 4294966784  ;;  %vm116_vm0 = vcmask 261120   ;;  %v112_v1 = vld [vmem:[#allocation8] sm:$0xff]  ;;  %v113_v2 = vld [vmem:[#allocation8 + $0x8] sm:$0xff]  ;;  %s799_s5 = smov [#allocation13]  }
  0x6e   :  { %vm960_vm1 = vmpackc.low %vm116_vm0, %vm116_vm0  ;;  %v114_v3 = vld [vmem:[#allocation8 + $0x10] sm:$0xff]  ;;  %v534_v4 = vpack.c.bf16 %v113_v2, %v112_v1  ;;  %v115_v5 = vld [vmem:[#allocation8 + $0x18] sm:$0xff]  ;;  %s419_s9 = sshll.u32 %s799_s5, 4  ;;  %s800_s10 = smov [#allocation14]   ;;  %s420_s9 = int_to_ptr.vmem [resolvable:$true] %s419_s9 }
  0x6f   :  { %v214_v6 = vld [vmem:[#allocation10] sm:$0xff]  ;;  %v215_v7 = vld [vmem:[#allocation10 + $0x8] sm:$0xff]  ;;  %v540_v8 = vpack.c.bf16 %v115_v5, %v114_v3  ;;  %v110_v10 = vld [vmem:[#allocation2] sm:$0xff]  ;;  %s431_s11 = sshll.u32 %s800_s10, 4  ;;  %s713_s13 = scalar_lea.vmem %s420_s9, 256  ;;  %s995_s11 = int_to_ptr.vmem [resolvable:$true] %s431_s11 }
  0x70   :  { %v546_v9 = vpack.c.bf16 %v215_v7, %v214_v6  ;;  %536 = vmatprep.subr.msk.bf16.mxu0 %vm960_vm1, %v534_v4  ;;  %509 = vmatprep.mubr.msk.f32.mxu0 %vm116_vm0, %v110_v10  ;;  %v216_v11 = vld [vmem:[#allocation10 + $0x10] sm:$0xff]  ;;  %v217_v12 = vld [vmem:[#allocation10 + $0x18] sm:$0xff]  ;;  %v212_v14 = vld [vmem:[#allocation5] sm:$0xff]  ;;  %p714_p6 = scmp.ne.s32.totalorder %s420_s9, %s713_s13  ;;  %p718_p7 = scmp.lt.s32.totalorder %s420_s9, %s420_s9 }
  0x71   :  { %539 = vmatpush3.bf16.xpose.msk.msra.mxu0 %vm960_vm1, %v534_v4  ;;  %v552_v13 = vpack.c.bf16 %v217_v12, %v216_v11  ;;  %v315_v15 = vld [vmem:[#allocation11] sm:$0xff]  ;;  %v316_v16 = vld [vmem:[#allocation11 + $0x8] sm:$0xff]  ;;  %520 = vmatprep.mubr.msk.f32.mxu1 %vm116_vm0, %v212_v14  ;;  %v317_v18 = vld [vmem:[#allocation11 + $0x10] sm:$0xff]  ;;  %p719_p8 = scmp.lt.s32.totalorder %s713_s13, %s713_s13 }
  0x72   :  { %548 = vmatprep.subr.msk.bf16.mxu1 %vm960_vm1, %v546_v9  ;;  %542 = vmatprep.subr.msk.bf16.mxu0 %vm960_vm1, %v540_v8  ;;  %v558_v17 = vpack.c.bf16 %v316_v16, %v315_v15  ;;  %v318_v19 = vld [vmem:[#allocation11 + $0x18] sm:$0xff]  ;;  %v213_v22 = vld [vmem:[#allocation5 + $0x8] sm:$0xff]  ;;  %v313_v23 = vld [vmem:[#allocation7] sm:$0xff] }
  0x73   :  { %551 = vmatpush3.bf16.xpose.msk.msra.mxu1 %vm960_vm1, %v546_v9  ;;  %v111_v20 = vld [vmem:[#allocation2 + $0x8] sm:$0xff]  ;;  %v564_v21 = vpack.c.bf16 %v318_v19, %v317_v18  ;;  %p720_p9 = por %p719_p8, %p718_p7 }
  0x74   :  { %554 = vmatprep.subr.msk.bf16.mxu1 %vm960_vm1, %v552_v13  ;;  %v314_v24 = vld [vmem:[#allocation7 + $0x8] sm:$0xff] }
  0x75   :  { %p721_p10 = pnand %p720_p9, %p714_p6 }
  0x79   :  { %545 = vmatpush3.bf16.xpose.msk.msra.mxu0 %vm960_vm1, %v540_v8 }
  0x7a   :  { %560 = vmatprep.subr.msk.bf16.mxu0 %vm960_vm1, %v558_v17 }
  0x7b   :  { %557 = vmatpush3.bf16.xpose.msk.msra.mxu1 %vm960_vm1, %v552_v13 }
  0x80   :  { %510 = vmatmul.mubr.msk.f32.vlgmr.msra.gmra.mrb[0].mxu0 %vm116_vm0, %v111_v20 }
  0x81   :  { %563 = vmatpush3.bf16.xpose.msk.msra.mxu0 %vm960_vm1, %v558_v17  ;;  %531 = vmatprep.mubr.msk.f32.mxu0 %vm116_vm0, %v313_v23 }
  0x82   :  { %521 = vmatmul.mubr.msk.f32.vlgmr.msra.gmra.mrb[0].mxu1 %vm116_vm0, %v213_v22  ;;  %566 = vmatprep.subr.msk.bf16.mxu0 %vm960_vm1, %v564_v21 }
  0x89   :  { %569 = vmatpush3.bf16.xpose.msk.msra.mxu0 %vm960_vm1, %v564_v21 }
  0x90   :  { %532 = vmatmul.mubr.msk.f32.vlgmr.msra.gmra.mrb[2].mxu0 %vm116_vm0, %v314_v24 }
 0x153   :  { %v511_v25 = vpop.f32.mrb[0].mxu0 }
 0x154   :  { %211 = vst.msk [vmem:[#allocation13 + $0x8] sm:$0xff] %vm116_vm0, %v511_v25  ;;  %v201_v26 = vpop.f32.mrb[1].mxu0 }
 0x155   :  { %v522_v27 = vpop.f32.mrb[0].mxu1  ;;  %210 = vst.msk [vmem:[#allocation13] sm:$0xff] %vm116_vm0, %v201_v26 }
 0x156   :  { %312 = vst.msk [vmem:[#allocation14 + $0x8] sm:$0xff] %vm116_vm0, %v522_v27  ;;  %v302_v28 = vpop.f32.mrb[1].mxu1 }
 0x157   :  { %311 = vst.msk [vmem:[#allocation14] sm:$0xff] %vm116_vm0, %v302_v28 }
 0x158   :  { %724 = shalt.err (!%p721_p10)
}
 0x159   :  { %s725_s16 = scalar_lea.hbm %s1058_s6, 256 }
 0x15a   :  { %p726_p11 = scmp.ne.s32.totalorder %s1058_s6, %s725_s16  ;;  %p729_p12 = scmp.lt.u32.totalorder %s725_s16, %s1058_s6 }
 0x15c   :  { %p731_p13 = pnand %p729_p12, %p726_p11 }
 0x15e   :  { %734 = shalt.err (!%p731_p13)
}
 0x15f   :  { %425 = dma.vmem_to_hbm [thread:$0]  %s420_s9, 256, %s1058_s6, [#allocation4], %s793_s17, %s793_s17, %s794_s18  }
 0x160   :  { %s735_s12 = scalar_lea.vmem %s995_s11, 256  ;;  %p740_p1 = scmp.lt.s32.totalorder %s995_s11, %s995_s11 }
 0x161   :  { %p736_p0 = scmp.ne.s32.totalorder %s995_s11, %s735_s12  ;;  %p741_p2 = scmp.lt.s32.totalorder %s735_s12, %s735_s12 }
 0x163   :  { %p742_p3 = por %p741_p2, %p740_p1 }
 0x165   :  { %p743_p4 = pnand %p742_p3, %p736_p0 }
 0x167   :  { %746 = shalt.err (!%p743_p4)
}
 0x168   :  { %s747_s24 = scalar_lea.hbm %s1059_s7, 256 }
 0x169   :  { %p748_p5 = scmp.ne.s32.totalorder %s1059_s7, %s747_s24  ;;  %p751_p6 = scmp.lt.u32.totalorder %s747_s24, %s1059_s7 }
 0x16b   :  { %p753_p7 = pnand %p751_p6, %p748_p5 }
 0x16d   :  { %756 = shalt.err (!%p753_p7)
}
 0x16e   :  { %437 = dma.vmem_to_hbm [thread:$0]  %s995_s11, 256, %s1059_s7, [#allocation15], %s793_s17, %s793_s17, %s794_s18   ;;  %v533_v29 = vpop.f32.mrb[2].mxu0 }
 0x16f   :  { %s801_s28 = smov [#allocation16]   ;;  %413 = vst.msk [vmem:[#allocation16 + $0x8] sm:$0xff] %vm116_vm0, %v533_v29  ;;  %v403_v30 = vpop.f32.mrb[3].mxu0 }
 0x170   :  { %s443_s4 = sshll.u32 %s801_s28, 4  ;;  %412 = vst.msk [vmem:[#allocation16] sm:$0xff] %vm116_vm0, %v403_v30  ;;  %s444_s4 = int_to_ptr.vmem [resolvable:$true] %s443_s4 }
 0x171   :  { %s757_s0 = scalar_lea.vmem %s444_s4, 256  ;;  %p762_p9 = scmp.lt.s32.totalorder %s444_s4, %s444_s4 }
 0x172   :  { %p758_p8 = scmp.ne.s32.totalorder %s444_s4, %s757_s0  ;;  %p763_p10 = scmp.lt.s32.totalorder %s757_s0, %s757_s0 }
 0x174   :  { %p764_p11 = por %p763_p10, %p762_p9 }
 0x176   :  { %p765_p12 = pnand %p764_p11, %p758_p8 }
 0x178   :  { %768 = shalt.err (!%p765_p12)
}
 0x179   :  { %s769_s7 = scalar_lea.hbm %s1060_s8, 256 }
 0x17a   :  { %p770_p13 = scmp.ne.s32.totalorder %s1060_s8, %s769_s7  ;;  %p773_p0 = scmp.lt.u32.totalorder %s769_s7, %s1060_s8 }
 0x17c   :  { %p775_p1 = pnand %p773_p0, %p770_p13 }
 0x17e   :  { %778 = shalt.err (!%p775_p1)
}
 0x17f   :  { %449 = dma.vmem_to_hbm [thread:$0]  %s444_s4, 256, %s1060_s8, [#allocation15], %s793_s17, %s793_s17, %s794_s18  }
 0x180   :  { %787 = dma.done.wait [#allocation4], 256  }
 0x181   :  { %788 = vsyncadd [#allocation4], 4294967040 }
 0x182   :  { %789 = dma.done.wait [#allocation15], 512  }
 0x183   :  { %790 = vsyncadd [#allocation15], 4294966784 }
 0x184   :  { %459 = vsyncpa [#allocation3], 1 }
 0x185   :  { %460 = vsyncpa [#allocation6], 1 }
 0x186   :  { %461 = vsyncpa [#allocation9], 1 }
 0x187   :  { %462 = vsyncpa [#allocation12], 1 }
 0x188   :  { %463 = vsyncpa [#allocation4], 1 }
 0x189   :  { %464 = vsyncpa [#allocation15], 1 }

</bundles_post_ra>
